<compile_context>
chip_gen: v5e
topology: v5e:2x2
jax: 0.10.0
libtpu: 0.0.40
codegen_flags: <defaults>
</compile_context>

<pallas_src>
import jax
import jax.numpy as jnp
from jax.experimental import pallas as pl
from jax.experimental.pallas import tpu as pltpu


def _round_up(x, m):
    return ((x + m - 1) // m) * m


def _glove_loss_kernel(ce_ref, te_ref, b_ref, w_ref, sel_ref, out_ref, acc_ref):
    # ce_ref / te_ref : (TBr, R*D)  packed gathered center / target embeddings
    # b_ref           : (TBr, R)    center_bias + target_bias - coocs (packed)
    # w_ref           : (TBr, R)    weights (packed; 0 for padding rows)
    # sel_ref         : (R*D, R)    block-diagonal 0/1 selector (resident)
    # out_ref         : (8, 128)    per-core output tile (written on last step)
    # acc_ref         : (1, R)      f32 VMEM accumulator (per-core, lane-wide)
    step = pl.program_id(1)

    @pl.when(step == 0)
    def _init():
        acc_ref[...] = jnp.zeros_like(acc_ref)

    # Elementwise product on full-width, lane-dense vregs.
    prod = ce_ref[...].astype(jnp.float32) * te_ref[...].astype(jnp.float32)

    # Segmented per-row sums (groups of D lanes) done on the otherwise-idle MXU:
    # inner[i, r] = sum_d ce[i*R + r, d] * te[i*R + r, d]
    inner = jnp.dot(prod, sel_ref[...], preferred_element_type=jnp.float32)   # (TBr, R)

    diff = inner + b_ref[...]
    loss = w_ref[...] * diff * diff                                           # (TBr, R)

    # Cheap sublane reduce into the lane-wide accumulator (hidden under DMA).
    acc_ref[...] += jnp.sum(loss, axis=0, keepdims=True)                      # (1, R)

    @pl.when(step == pl.num_programs(1) - 1)
    def _store():
        r = acc_ref.shape[1]
        out_ref[...] = jnp.zeros_like(out_ref)
        out_ref[0:1, 0:r] = acc_ref[...]


def glove_forward(params, center_words, target_words, coocs, weights, *,
                  embed_dtype=jnp.float32,      # set jnp.bfloat16 to halve embed HBM traffic
                  num_cores=2,                  # leading "parallel" axis (v7x megacore)
                  vmem_block_budget_bytes=16 * 1024 * 1024,
                  tb_cap=32768):
    """params: dict of embedding tables.  center_words/target_words: (B, 1) int.
    coocs/weights: (B, 1) float.  Returns scalar f32 loss."""
    emb_v = params["embedding_v"]
    emb_u = params["embedding_u"]
    v_bias = params["v_bias"]
    u_bias = params["u_bias"]

    B = center_words.shape[0]
    D = emb_v.shape[1]

    # Lane packing factor: how many batch rows share one 128-lane vreg row.
    R = 128 // D if (D <= 128 and 128 % D == 0) else 1
    # TB alignment keeps both the lane rule (128) and the sublane rule on the
    # packed (TB // R, ...) blocks (16 covers bf16 as well as f32).
    align = max(128, 16 * R)

    # D-aware tile size: biggest TB whose double-buffered VMEM footprint fits
    # the budget (narrow side arrays are lane-padded to 128 in VMEM).
    lane_emb = _round_up(R * D, 128)
    lane_side = 128
    bytes_per_packed_row = 4 * 2 * (2 * lane_emb + 2 * lane_side)   # f32, 2 bufs
    tbr_budget = max(8, vmem_block_budget_bytes // bytes_per_packed_row)
    TB = max(align, (tbr_budget * R // align) * align)
    TB = min(TB, _round_up(tb_cap, align))
    TB = min(TB, _round_up(B, align))      # don't over-pad tiny batches

    Bp = _round_up(B, num_cores * TB)
    pad = Bp - B

    # Pad the *indices* (and per-row scalars), not the gathered activations,
    # so no extra full-size pad pass over HBM is needed.  weight == 0 on pad
    # rows -> exactly zero loss contribution.
    c_idx = jnp.pad(center_words.reshape(B).astype(jnp.int32), (0, pad))
    t_idx = jnp.pad(target_words.reshape(B).astype(jnp.int32), (0, pad))
    w = jnp.pad(weights.reshape(B).astype(jnp.float32), (0, pad))
    cooc = jnp.pad(coocs.reshape(B).astype(jnp.float32), (0, pad))

    # Glue: embedding gathers stay in XLA (see TODO above); NO transposes.
    ce = jnp.take(emb_v, c_idx, axis=0).astype(embed_dtype)                 # (Bp, D)
    te = jnp.take(emb_u, t_idx, axis=0).astype(embed_dtype)                 # (Bp, D)
    cb = jnp.take(v_bias.reshape(-1), c_idx, axis=0).astype(jnp.float32)    # (Bp,)
    tb = jnp.take(u_bias.reshape(-1), t_idx, axis=0).astype(jnp.float32)    # (Bp,)
    b = cb + tb - cooc                                                      # (Bp,)

    # Free row-major views: pack R consecutive rows per 128-lane row.
    TBr = TB // R
    ce_p = ce.reshape(Bp // R, R * D)
    te_p = te.reshape(Bp // R, R * D)
    b_p = b.reshape(Bp // R, R)
    w_p = w.reshape(Bp // R, R)

    # Block-diagonal selector: sel[l, r] = 1 iff lane l belongs to packed row r.
    sel = (jnp.arange(R * D)[:, None] // D == jnp.arange(R)[None, :]).astype(jnp.float32)

    total_tiles = Bp // TB
    per_core = total_tiles // num_cores
    grid = (num_cores, per_core)

    row_map = lambda c, i: (c * per_core + i, 0)

    out = pl.pallas_call(
        _glove_loss_kernel,
        out_shape=jax.ShapeDtypeStruct((num_cores * 8, 128), jnp.float32),
        grid=grid,
        in_specs=[
            pl.BlockSpec((TBr, R * D), row_map),
            pl.BlockSpec((TBr, R * D), row_map),
            pl.BlockSpec((TBr, R), row_map),
            pl.BlockSpec((TBr, R), row_map),
            pl.BlockSpec((R * D, R), lambda c, i: (0, 0)),   # resident selector
        ],
        out_specs=pl.BlockSpec((8, 128), lambda c, i: (c, 0)),
        scratch_shapes=[pltpu.VMEM((1, R), jnp.float32)],
        compiler_params=pltpu.CompilerParams(
            dimension_semantics=("parallel", "arbitrary"),
            vmem_limit_bytes=32 * 1024 * 1024,   # raise v5e's 16 MiB default
        ),
    )(ce_p, te_p, b_p, w_p, sel)

    # Each core wrote its partial into its own zeroed (8,128) block.
    return jnp.sum(out)


def init_glove_params(key, vocab_size, projection_dim):
    initrange = (2.0 / (vocab_size + projection_dim)) ** 0.5
    k1, k2, k3, k4 = jax.random.split(key, 4)
    u = lambda k, shape: jax.random.uniform(
        k, shape, dtype=jnp.float32, minval=-initrange, maxval=initrange
    )
    return {
        "embedding_v": u(k1, (vocab_size, projection_dim)),
        "embedding_u": u(k2, (vocab_size, projection_dim)),
        "v_bias": u(k3, (vocab_size, 1)),
        "u_bias": u(k4, (vocab_size, 1)),
    }


def _reference_forward(params, center_words, target_words, coocs, weights):
    # Pure-JAX reference mirroring the PyTorch forward exactly.
    B = center_words.shape[0]
    c_idx = center_words.reshape(B)
    t_idx = target_words.reshape(B)
    ce = jnp.take(params["embedding_v"], c_idx, axis=0)   # (B, D)
    te = jnp.take(params["embedding_u"], t_idx, axis=0)   # (B, D)
    cb = jnp.take(params["v_bias"], c_idx, axis=0)        # (B, 1)
    tb = jnp.take(params["u_bias"], t_idx, axis=0)        # (B, 1)
    inner = jnp.sum(ce * te, axis=-1, keepdims=True)      # (B, 1)
    loss = weights.reshape(B, 1) * jnp.square(
        inner + cb + tb - coocs.reshape(B, 1)
    )
    return jnp.sum(loss)


if __name__ == "__main__":
    vocab_size = 64
    projection_dim = 32
    batch = 8

    key = jax.random.PRNGKey(0)
    kp, kc, kt, kx, kw = jax.random.split(key, 5)

    params = init_glove_params(kp, vocab_size, projection_dim)

    center_words = jax.random.randint(kc, (batch, 1), 0, vocab_size, dtype=jnp.int32)
    target_words = jax.random.randint(kt, (batch, 1), 0, vocab_size, dtype=jnp.int32)
    coocs = jax.random.uniform(kx, (batch, 1), dtype=jnp.float32) * 3.0
    weights = jax.random.uniform(kw, (batch, 1), dtype=jnp.float32)

    loss = jax.jit(glove_forward)(params, center_words, target_words, coocs, weights)
    loss = jax.block_until_ready(loss)

    ref = _reference_forward(params, center_words, target_words, coocs, weights)
    ref = jax.block_until_ready(ref)

    # Tolerance: chunked/padded reduction order differs from the single-sum
    # reference, and the f32 per-row dots go through the MXU (whose f32 path
    # may use reduced-precision passes).  Structural errors would be orders of
    # magnitude off, so this still validates the computation.
    assert jnp.allclose(loss, ref, rtol=5e-3, atol=1e-3), (loss, ref)

    print("KERNEL_OK")
</pallas_src>

<mosaic_0001>
module attributes {stable_mosaic.version = 11 : i64} {
  func.func @_glove_loss_kernel(%arg0: i32, %arg1: i32, %arg2: memref<32x128xf32, #tpu.memory_space<vmem>>, %arg3: memref<32x128xf32, #tpu.memory_space<vmem>>, %arg4: memref<32x4xf32, #tpu.memory_space<vmem>>, %arg5: memref<32x4xf32, #tpu.memory_space<vmem>>, %arg6: memref<128x4xf32, #tpu.memory_space<vmem>>, %arg7: memref<8x128xf32, #tpu.memory_space<vmem>>, %arg8: memref<1x4xf32, #tpu.memory_space<vmem>>) attributes {dimension_semantics = [#tpu.dimension_semantics<parallel>, #tpu.dimension_semantics<arbitrary>], iteration_bounds = array<i64: 2, 1>, scalar_prefetch = 0 : i64, scratch_operands = 1 : i64, tpu.core_type = #tpu.core_type<tc>, window_params = [{transform_indices = @transform_0, window_bounds = array<i64: 32, 128>}, {transform_indices = @transform_1, window_bounds = array<i64: 32, 128>}, {transform_indices = @transform_2, window_bounds = array<i64: 32, 4>}, {transform_indices = @transform_3, window_bounds = array<i64: 32, 4>}, {pipeline_mode = #tpu.pipeline_mode<synchronous>, transform_indices = @transform_4, window_bounds = array<i64: 128, 4>}, {transform_indices = @transform_5, window_bounds = array<i64: 8, 128>}]} {
    %c0_i32 = arith.constant 0 : i32
    %0 = arith.cmpi eq, %arg1, %c0_i32 : i32
    %1 = arith.extui %0 : i1 to i32
    %c0_i32_0 = arith.constant 0 : i32
    %2 = arith.cmpi ne, %1, %c0_i32_0 : i32
    scf.if %2 {
      %cst_17 = arith.constant 0.000000e+00 : f32
      %21 = vector.broadcast %cst_17 : f32 to vector<1x4xf32>
      %c0_18 = arith.constant 0 : index
      %c0_19 = arith.constant 0 : index
      %22 = vector.load %arg8[%c0_18, %c0_19] : memref<1x4xf32, #tpu.memory_space<vmem>>, vector<1x4xf32>
      tpu.vector_store %arg8[%c0_18, %c0_19], %21 {strides = array<i32>} : memref<1x4xf32, #tpu.memory_space<vmem>>, vector<1x4xf32>,
    } else {
    }
    %c0 = arith.constant 0 : index
    %c0_1 = arith.constant 0 : index
    %3 = vector.load %arg2[%c0, %c0_1] : memref<32x128xf32, #tpu.memory_space<vmem>>, vector<32x128xf32>
    %c0_2 = arith.constant 0 : index
    %c0_3 = arith.constant 0 : index
    %4 = vector.load %arg3[%c0_2, %c0_3] : memref<32x128xf32, #tpu.memory_space<vmem>>, vector<32x128xf32>
    %5 = arith.mulf %3, %4 : vector<32x128xf32>
    %c0_4 = arith.constant 0 : index
    %c0_5 = arith.constant 0 : index
    %6 = vector.load %arg6[%c0_4, %c0_5] : memref<128x4xf32, #tpu.memory_space<vmem>>, vector<128x4xf32>
    %cst = arith.constant dense<0.000000e+00> : vector<32x4xf32>
    %7 = tpu.matmul %5, %6, %cst {dimension_numbers = #tpu.dot_dimension_numbers<[1], [0], [0], [1], [0, 0, 1, 1], [], []>} : vector<32x128xf32>, vector<128x4xf32>, vector<32x4xf32> -> vector<32x4xf32>
    %c0_6 = arith.constant 0 : index
    %c0_7 = arith.constant 0 : index
    %8 = vector.load %arg4[%c0_6, %c0_7] : memref<32x4xf32, #tpu.memory_space<vmem>>, vector<32x4xf32>
    %9 = arith.addf %7, %8 : vector<32x4xf32>
    %c0_8 = arith.constant 0 : index
    %c0_9 = arith.constant 0 : index
    %10 = vector.load %arg5[%c0_8, %c0_9] : memref<32x4xf32, #tpu.memory_space<vmem>>, vector<32x4xf32>
    %11 = arith.mulf %10, %9 : vector<32x4xf32>
    %12 = arith.mulf %11, %9 : vector<32x4xf32>
    %c0_10 = arith.constant 0 : index
    %c0_11 = arith.constant 0 : index
    %13 = vector.load %arg8[%c0_10, %c0_11] : memref<1x4xf32, #tpu.memory_space<vmem>>, vector<1x4xf32>
    %cst_12 = arith.constant dense<0.000000e+00> : vector<4xf32>
    %14 = vector.multi_reduction <add>, %12, %cst_12 [0] : vector<32x4xf32> to vector<4xf32>
    %15 = vector.shape_cast %14 : vector<4xf32> to vector<1x4xf32>
    %16 = arith.addf %13, %15 : vector<1x4xf32>
    %c0_13 = arith.constant 0 : index
    %c0_14 = arith.constant 0 : index
    %17 = vector.load %arg8[%c0_13, %c0_14] : memref<1x4xf32, #tpu.memory_space<vmem>>, vector<1x4xf32>
    tpu.vector_store %arg8[%c0_13, %c0_14], %16 {strides = array<i32>} : memref<1x4xf32, #tpu.memory_space<vmem>>, vector<1x4xf32>,
    %c0_i32_15 = arith.constant 0 : i32
    %18 = arith.cmpi eq, %arg1, %c0_i32_15 : i32
    %19 = arith.extui %18 : i1 to i32
    %c0_i32_16 = arith.constant 0 : i32
    %20 = arith.cmpi ne, %19, %c0_i32_16 : i32
    scf.if %20 {
      %cst_17 = arith.constant 0.000000e+00 : f32
      %21 = vector.broadcast %cst_17 : f32 to vector<8x128xf32>
      %c0_18 = arith.constant 0 : index
      %c0_19 = arith.constant 0 : index
      %22 = vector.load %arg7[%c0_18, %c0_19] : memref<8x128xf32, #tpu.memory_space<vmem>>, vector<8x128xf32>
      tpu.vector_store %arg7[%c0_18, %c0_19], %21 {strides = array<i32>} : memref<8x128xf32, #tpu.memory_space<vmem>>, vector<8x128xf32>,
      %c0_20 = arith.constant 0 : index
      %c0_21 = arith.constant 0 : index
      %23 = vector.load %arg8[%c0_20, %c0_21] : memref<1x4xf32, #tpu.memory_space<vmem>>, vector<1x4xf32>
      %c0_22 = arith.constant 0 : index
      %c0_23 = arith.constant 0 : index
      %24 = vector.load %arg7[%c0_22, %c0_23] : memref<8x128xf32, #tpu.memory_space<vmem>>, vector<1x4xf32>
      tpu.vector_store %arg7[%c0_22, %c0_23], %23 {strides = array<i32>} : memref<8x128xf32, #tpu.memory_space<vmem>>, vector<1x4xf32>,
    } else {
    }
    return
  }
  func.func @transform_0(%arg0: i32, %arg1: i32) -> (i32, i32) {
    %c1_i32 = arith.constant 1 : i32
    %0 = arith.muli %arg0, %c1_i32 : i32
    %1 = arith.addi %0, %arg1 : i32
    %c0_i32 = arith.constant 0 : i32
    %c0_i32_0 = arith.constant 0 : i32
    return %1, %c0_i32 : i32, i32
  }
  func.func @transform_1(%arg0: i32, %arg1: i32) -> (i32, i32) {
    %c1_i32 = arith.constant 1 : i32
    %0 = arith.muli %arg0, %c1_i32 : i32
    %1 = arith.addi %0, %arg1 : i32
    %c0_i32 = arith.constant 0 : i32
    %c0_i32_0 = arith.constant 0 : i32
    return %1, %c0_i32 : i32, i32
  }
  func.func @transform_2(%arg0: i32, %arg1: i32) -> (i32, i32) {
    %c1_i32 = arith.constant 1 : i32
    %0 = arith.muli %arg0, %c1_i32 : i32
    %1 = arith.addi %0, %arg1 : i32
    %c0_i32 = arith.constant 0 : i32
    %c0_i32_0 = arith.constant 0 : i32
    return %1, %c0_i32 : i32, i32
  }
  func.func @transform_3(%arg0: i32, %arg1: i32) -> (i32, i32) {
    %c1_i32 = arith.constant 1 : i32
    %0 = arith.muli %arg0, %c1_i32 : i32
    %1 = arith.addi %0, %arg1 : i32
    %c0_i32 = arith.constant 0 : i32
    %c0_i32_0 = arith.constant 0 : i32
    return %1, %c0_i32 : i32, i32
  }
  func.func @transform_4(%arg0: i32, %arg1: i32) -> (i32, i32) {
    %c0_i32 = arith.constant 0 : i32
    %c0_i32_0 = arith.constant 0 : i32
    %c0_i32_1 = arith.constant 0 : i32
    return %c0_i32, %c0_i32_0 : i32, i32
  }
  func.func @transform_5(%arg0: i32, %arg1: i32) -> (i32, i32) {
    %c0_i32 = arith.constant 0 : i32
    %c0_i32_0 = arith.constant 0 : i32
    return %arg0, %c0_i32 : i32, i32
  }
}

</mosaic_0001>

<bundles_post_ra>
// kernel: glove_forward.1
= control target key start
LH: loop header
LB: loop body
LE: loop exit
PB: predicated region body
PF: predicated region fallthrough
CT: control target
= control target key end

     0   :  { %s675_s18 = smov 0   ;;  %s677_s19 = smov 0   ;;  %s787_s0 = inlined_call_operand.vmem [shape: f32[64,128], index: 0, kind: input, shape index: {}]   ;;  %s788_s1 = inlined_call_operand.vmem [shape: f32[64,128], index: 1, kind: input, shape index: {}]   ;;  %s789_s2 = inlined_call_operand.vmem [shape: f32[64,4], index: 2, kind: input, shape index: {}]   ;;  %s790_s3 = inlined_call_operand.vmem [shape: f32[64,4], index: 3, kind: input, shape index: {}]   ;;  %s791_s4 = inlined_call_operand.vmem [shape: f32[128,4], index: 4, kind: input, shape index: {}]   ;;  %s792_s5 = inlined_call_operand.vmem [shape: f32[16,128], index: 5, kind: output, shape index: {}]  }
   0x1   :  { %s679_s20 = smov 0  }
   0x2 LB: > { %s27_s21 = sadd.s32 1, %s638_s19  ;;  %p535_p0 = scmp.ge.s32.totalorder %s642_s20, 1  ;;  %s642_s20 = sphi %s679_s20, %s15_s20   ;;  %s638_s19 = sphi %s677_s19, %s794_s19   ;;  %s634_s18 = sphi %s675_s18, %s793_s18  }
   0x3   : > { %p29_p1 = scmp.ge.s32.totalorder %s27_s21, 2  ;;  %p249_p2 = scmp.lt.s32.totalorder %s642_s20, 3 }
   0x5   : > { %s796_s21 = smov (%p29_p1, %s27_s21), 0  ;;  %p250_p3 = pnand %p535_p0, %p249_p2 }
   0x6   : > { %s536_s7 = sshll.u32 (!%p250_p3), %s634_s18, 2  ;;  %p327_p5 = scmp.lt.s32.totalorder (!%p250_p3), %s634_s18, 1 }
   0x7   : > { %253 = sbr.rel (%p250_p3) target bundleno = 210 (0xd2), region = 40  ;;  %p297_p4 = scmp.lt.s32.totalorder (!%p250_p3), %s536_s7, 7 }
   0xc   : > { %v364_v0 = vld [vmem:[%s791_s4 + $0x78] sm:$0xff]  ;;  %v363_v1 = vld [vmem:[%s791_s4 + $0x70] sm:$0xff]  ;;  %v362_v2 = vld [vmem:[%s791_s4 + $0x68] sm:$0xff]  ;;  %s798_s7 = smov (!%p297_p4, %s536_s7), 7  ;;  %s800_s18 = smov (!%p327_p5, %s634_s18), 1  ;;  %vm335_vm0 = vcmask 24576  }
   0xd   : > { %548 = vmatpush.msra.mxu2 %v364_v0  ;;  %549 = vmatpush.msra.mxu3 %v364_v0  ;;  %v361_v3 = vld [vmem:[%s791_s4 + $0x60] sm:$0xff]  ;;  %v360_v4 = vld [vmem:[%s791_s4 + $0x58] sm:$0xff]  ;;  %v359_v5 = vld [vmem:[%s791_s4 + $0x50] sm:$0xff]  ;;  %s729_s24 = sshll.u32 %s798_s7, 3  ;;  %s544_s16 = sshll.u32 %s800_s18, 3  ;;  %v644_v28 = vmov 0.0  }
   0xe   : > { %369 = vmatpush.msra.mxu0 %v364_v0  ;;  %547 = vmatpush.msra.mxu1 %v364_v0  ;;  %v358_v6 = vld [vmem:[%s791_s4 + $0x48] sm:$0xff]  ;;  %v357_v7 = vld [vmem:[%s791_s4 + $0x40] sm:$0xff]  ;;  %v356_v8 = vld [vmem:[%s791_s4 + $0x38] sm:$0xff]  ;;  %s300_s29 = scalar_lea.vmem %s787_s0, %s729_s24  ;;  %s308_s9 = scalar_lea.vmem %s788_s1, %s729_s24  ;;  %336 = vst.msk [vmem:[#allocation2] sm:$0x1] %vm335_vm0, %v644_v28  ;;  %vm411_vm1 = vcmask 31744  }
   0xf   : > { %551 = vmatpush.msra.mxu2 %v363_v1  ;;  %552 = vmatpush.msra.mxu3 %v363_v1  ;;  %v355_v9 = vld [vmem:[%s791_s4 + $0x30] sm:$0xff]  ;;  %v354_v10 = vld [vmem:[%s791_s4 + $0x28] sm:$0xff]  ;;  %v353_v11 = vld [vmem:[%s791_s4 + $0x20] sm:$0xff]  ;;  %s759_s23 = scalar_lea.vmem %s792_s5, %s544_s16  ;;  %s316_s27 = scalar_lea.vmem %s789_s2, %s729_s24 }
  0x10   : > { %370 = vmatpush.msra.mxu0 %v363_v1  ;;  %550 = vmatpush.msra.mxu1 %v363_v1  ;;  %v352_v12 = vld [vmem:[%s791_s4 + $0x18] sm:$0xff]  ;;  %v351_v13 = vld [vmem:[%s791_s4 + $0x10] sm:$0xff]  ;;  %v350_v18 = vld [vmem:[%s791_s4 + $0x8] sm:$0xff]  ;;  %431 = vst [vmem:[%s759_s23] sm:$0xff] %v644_v28  ;;  %s324_s30 = scalar_lea.vmem %s790_s3, %s729_s24 }
  0x11   : > { %554 = vmatpush.msra.mxu2 %v362_v2  ;;  %555 = vmatpush.msra.mxu3 %v362_v2  ;;  %v339_v14 = vld [vmem:[%s300_s29 + $0x10] sm:$0xff]  ;;  %v340_v16 = vld [vmem:[%s300_s29 + $0x18] sm:$0xff]  ;;  %v337_v19 = vld [vmem:[%s300_s29] sm:$0xff] }
  0x12   : > { %371 = vmatpush.msra.mxu0 %v362_v2  ;;  %553 = vmatpush.msra.mxu1 %v362_v2  ;;  %v343_v15 = vld [vmem:[%s308_s9 + $0x10] sm:$0xff]  ;;  %v344_v17 = vld [vmem:[%s308_s9 + $0x18] sm:$0xff]  ;;  %v341_v20 = vld [vmem:[%s308_s9] sm:$0xff] }
  0x13   : > { %557 = vmatpush.msra.mxu2 %v361_v3  ;;  %558 = vmatpush.msra.mxu3 %v361_v3  ;;  %v338_v21 = vld [vmem:[%s300_s29 + $0x8] sm:$0xff]  ;;  %v349_v23 = vld [vmem:[%s791_s4] sm:$0xff]  ;;  %v347_v24 = vmul.f32 %v343_v15, %v339_v14  ;;  %v348_v25 = vmul.f32 %v344_v17, %v340_v16  ;;  %v345_v26 = vmul.f32 %v341_v20, %v337_v19  ;;  %v367_v37 = vld [vmem:[%s316_s27 + $0x10] sm:$0xff] }
  0x14   : > { %372 = vmatpush.msra.mxu0 %v361_v3  ;;  %556 = vmatpush.msra.mxu1 %v361_v3  ;;  %v342_v22 = vld [vmem:[%s308_s9 + $0x8] sm:$0xff]  ;;  %v365_v29 = vld [vmem:[%s316_s27] sm:$0xff]  ;;  %v368_v38 = vld [vmem:[%s316_s27 + $0x18] sm:$0xff] }
  0x15   : > { %560 = vmatpush.msra.mxu2 %v360_v4  ;;  %561 = vmatpush.msra.mxu3 %v360_v4  ;;  %v346_v27 = vmul.f32 %v342_v22, %v338_v21  ;;  %v366_v30 = vld [vmem:[%s316_s27 + $0x8] sm:$0xff]  ;;  %v398_v32 = vld [vmem:[%s324_s30] sm:$0xff]  ;;  %v400_v42 = vld [vmem:[%s324_s30 + $0x10] sm:$0xff] }
  0x16   : > { %373 = vmatpush.msra.mxu0 %v360_v4  ;;  %559 = vmatpush.msra.mxu1 %v360_v4  ;;  %v399_v34 = vld [vmem:[%s324_s30 + $0x8] sm:$0xff]  ;;  %v401_v44 = vld [vmem:[%s324_s30 + $0x18] sm:$0xff]  ;;  %v410_v1 = vld [vmem:[#allocation2] sm:$0x1] }
  0x17   : > { %563 = vmatpush.msra.mxu2 %v359_v5  ;;  %564 = vmatpush.msra.mxu3 %v359_v5 }
  0x18   : > { %374 = vmatpush.msra.mxu0 %v359_v5  ;;  %562 = vmatpush.msra.mxu1 %v359_v5 }
  0x19   : > { %566 = vmatpush.msra.mxu2 %v358_v6  ;;  %567 = vmatpush.msra.mxu3 %v358_v6 }
  0x1a   : > { %375 = vmatpush.msra.mxu0 %v358_v6  ;;  %565 = vmatpush.msra.mxu1 %v358_v6 }
  0x1b   : > { %569 = vmatpush.msra.mxu2 %v357_v7  ;;  %570 = vmatpush.msra.mxu3 %v357_v7 }
  0x1c   : > { %376 = vmatpush.msra.mxu0 %v357_v7  ;;  %568 = vmatpush.msra.mxu1 %v357_v7 }
  0x1d   : > { %572 = vmatpush.msra.mxu2 %v356_v8  ;;  %573 = vmatpush.msra.mxu3 %v356_v8 }
  0x1e   : > { %377 = vmatpush.msra.mxu0 %v356_v8  ;;  %571 = vmatpush.msra.mxu1 %v356_v8 }
  0x1f   : > { %575 = vmatpush.msra.mxu2 %v355_v9  ;;  %576 = vmatpush.msra.mxu3 %v355_v9 }
  0x20   : > { %378 = vmatpush.msra.mxu0 %v355_v9  ;;  %574 = vmatpush.msra.mxu1 %v355_v9 }
  0x21   : > { %578 = vmatpush.msra.mxu2 %v354_v10  ;;  %579 = vmatpush.msra.mxu3 %v354_v10 }
  0x22   : > { %379 = vmatpush.msra.mxu0 %v354_v10  ;;  %577 = vmatpush.msra.mxu1 %v354_v10 }
  0x23   : > { %581 = vmatpush.msra.mxu2 %v353_v11  ;;  %582 = vmatpush.msra.mxu3 %v353_v11 }
  0x24   : > { %380 = vmatpush.msra.mxu0 %v353_v11  ;;  %580 = vmatpush.msra.mxu1 %v353_v11 }
  0x25   : > { %584 = vmatpush.msra.mxu2 %v352_v12  ;;  %585 = vmatpush.msra.mxu3 %v352_v12 }
  0x26   : > { %381 = vmatpush.msra.mxu0 %v352_v12  ;;  %583 = vmatpush.msra.mxu1 %v352_v12 }
  0x27   : > { %587 = vmatpush.msra.mxu2 %v351_v13  ;;  %588 = vmatpush.msra.mxu3 %v351_v13 }
  0x28   : > { %382 = vmatpush.msra.mxu0 %v351_v13  ;;  %586 = vmatpush.msra.mxu1 %v351_v13 }
  0x29   : > { %590 = vmatpush.msra.mxu2 %v350_v18  ;;  %591 = vmatpush.msra.mxu3 %v350_v18 }
  0x2a   : > { %383 = vmatpush.msra.mxu0 %v350_v18  ;;  %589 = vmatpush.msra.mxu1 %v350_v18 }
  0x2b   : > { %593 = vmatpush.msra.mxu2 %v349_v23  ;;  %594 = vmatpush.msra.mxu3 %v349_v23 }
  0x2c   : > { %391 = vmatmul.f32.vlgmr.msra.gmra.mxu2 %v347_v24  ;;  %394 = vmatmul.f32.vlgmr.msra.gmra.mxu3 %v348_v25 }
  0x2d   : > { %384 = vmatpush.msra.mxu0 %v349_v23  ;;  %592 = vmatpush.msra.mxu1 %v349_v23 }
  0x2e   : > { %385 = vmatmul.f32.vlgmr.msra.gmra.mxu0 %v345_v26  ;;  %388 = vmatmul.f32.vlgmr.msra.gmra.mxu1 %v346_v27 }
  0xab   : > { %v386_v31 = vpop.f32.mrf.mxu0  ;;  %v389_v33 = vpop.f32.mrf.mxu1 }
  0xac   : > { %v387_v35 = vadd.f32 %v386_v31, %v365_v29  ;;  %v390_v36 = vadd.f32 %v389_v33, %v366_v30 }
  0xae   : > { %v402_v39 = vmul.f32 %v398_v32, %v387_v35  ;;  %v403_v40 = vmul.f32 %v399_v34, %v390_v36 }
  0xaf   : > { %v392_v41 = vpop.f32.mrf.mxu2  ;;  %v395_v43 = vpop.f32.mrf.mxu3 }
  0xb0   : > { %v406_v45 = vmul.f32 %v402_v39, %v387_v35  ;;  %v407_v46 = vmul.f32 %v403_v40, %v390_v36  ;;  %v393_v47 = vadd.f32 %v392_v41, %v367_v37  ;;  %v396_v48 = vadd.f32 %v395_v43, %v368_v38 }
  0xb2   : > { %v412_v49 = vsel %vm411_vm1, %v406_v45, 0.0  ;;  %v413_v50 = vsel %vm411_vm1, %v407_v46, 0.0  ;;  %v404_v51 = vmul.f32 %v400_v42, %v393_v47  ;;  %v405_v52 = vmul.f32 %v401_v44, %v396_v48 }
  0xb3   : > { %v414_v55 = vadd.f32 %v413_v50, %v412_v49 }
  0xb4   : > { %v408_v53 = vmul.f32 %v404_v51, %v393_v47  ;;  %v409_v54 = vmul.f32 %v405_v52, %v396_v48 }
  0xb6   : > { %v415_v56 = vsel %vm411_vm1, %v408_v53, 0.0  ;;  %v417_v58 = vsel %vm411_vm1, %v409_v54, 0.0 }
  0xb7   : > { %v416_v57 = vadd.f32 %v415_v56, %v414_v55 }
  0xb9   : > { %v418_v59 = vadd.f32 %v417_v58, %v416_v57 }
  0xbb   : > { %v419_v60 = vrot.slane %v418_v59, 4 }
  0xbd   : > { %v420_v61 = vadd.f32 %v419_v60, %v418_v59 }
  0xbf   : > { %v421_v62 = vrot.slane %v420_v61, 2 }
  0xc1   : > { %v422_v63 = vadd.f32 %v421_v62, %v420_v61 }
  0xc3   : > { %v423_v0 = vrot.slane %v422_v63, 1 }
  0xc5   : > { %v424_v2 = vadd.f32 %v423_v0, %v422_v63 }
  0xc7   : > { %v425_v3 = vadd.f32 %v424_v2, %v410_v1 }
  0xc9   : > { %427 = vst.msk [vmem:[#allocation2] sm:$0x1] %vm335_vm0, %v425_v3 }
  0xd0   : > { %v432_v4 = vld [vmem:[#allocation2] sm:$0x1] }
  0xd1   : > { %433 = vst.msk [vmem:[%s759_s23] sm:$0x1] %vm335_vm0, %v432_v4 }
  0xd2 PF: > { %s15_s20 = sadd.s32 1, %s642_s20   ;;  %s793_s18 = smov %s638_s19 }
  0xd3   : > { %p12_p6 = scmp.ge.s32.totalorder %s15_s20, 4   ;;  %s794_s19 = smov %s796_s21 }
  0xd5   :  { %14 = sbr.rel (!%p12_p6) target bundleno = 2 (0x2), region = 87 }

</bundles_post_ra>
